<compile_context>
chip_gen: v6e
topology: v6e:2x2x1
jax: 0.10.0
libtpu: 0.0.40
codegen_flags: <defaults>
</compile_context>

<pallas_src>
import functools

import jax
import jax.numpy as jnp
from jax import lax
from jax.experimental import pallas as pl
from jax.experimental.pallas import tpu as pltpu


def _round_up(v, m):
    return (v + m - 1) // m * m


# ---------------------------------------------------------------------------
# mean pooling kernel
# ---------------------------------------------------------------------------
def _mean_kernel(batch_ref, x_ref, o_ref, sum_ref, cnt_ref, *, num_graphs):
    """grid = (F_tiles, N_tiles); N axis (last) carries the accumulator."""
    i = pl.program_id(1)

    @pl.when(i == 0)
    def _init():
        sum_ref[...] = jnp.zeros_like(sum_ref)
        cnt_ref[...] = jnp.zeros_like(cnt_ref)

    # one-hot built directly as [B, TILE_N] (no transpose), lane-dense batch.
    graph_ids = lax.broadcasted_iota(jnp.int32, (num_graphs, 1), 0)   # [B, 1]
    one_hot = (graph_ids == batch_ref[...]).astype(x_ref.dtype)       # [B, TILE_N]

    sum_ref[...] += jnp.dot(one_hot, x_ref[...],
                            preferred_element_type=jnp.float32)       # [B, TILE_F]
    cnt_ref[...] += jnp.sum(one_hot.astype(jnp.float32),
                            axis=1, keepdims=True)                    # [B, 1]

    @pl.when(i == pl.num_programs(1) - 1)
    def _finalize():
        # NOTE: torch_geometric's global_mean_pool yields NaN (0/0) for empty
        # graphs; we clamp counts to 1 so empty graphs pool to 0 instead.
        cnt = jnp.maximum(cnt_ref[...], 1.0)
        inv = pl.reciprocal(cnt, approx=False)   # approx=True (EUP) if tol allows
        o_ref[...] = (sum_ref[...] * inv).astype(o_ref.dtype)


# ---------------------------------------------------------------------------
# max pooling kernel
# ---------------------------------------------------------------------------
def _max_kernel(batch_sref, ptr_sref, x_ref, o_ref, acc_ref, *,
                num_graphs, tile_n):
    """grid = (F_tiles, N_tiles); batch & ptr are scalar-prefetched in SMEM."""
    i = pl.program_id(1)
    neg = jnp.finfo(jnp.float32).min

    @pl.when(i == 0)
    def _init():
        acc_ref[...] = jnp.full_like(acc_ref, neg)

    x = x_ref[...].astype(jnp.float32)                                # [TILE_N, TILE_F]
    tile_start = i * tile_n

    # batch is sorted -> only graphs in [g_lo, g_hi] appear in this tile.
    g_lo = batch_sref[tile_start]
    g_hi = jnp.minimum(batch_sref[tile_start + tile_n - 1], num_graphs - 1)

    node_idx = tile_start + lax.broadcasted_iota(
        jnp.int32, (tile_n, 1), 0)                                    # global node index
    graph_ids = lax.broadcasted_iota(jnp.int32, (num_graphs, 1), 0)   # [B, 1]

    def body(g, tile_acc):
        lo = ptr_sref[g]
        hi = ptr_sref[g + 1]
        in_seg = (node_idx >= lo) & (node_idx < hi)                   # [TILE_N, 1]
        seg_max = jnp.max(jnp.where(in_seg, x, neg),
                          axis=0, keepdims=True)                      # [1, TILE_F]
        return jnp.maximum(tile_acc, jnp.where(graph_ids == g, seg_max, neg))

    tile_acc = lax.fori_loop(g_lo, g_hi + 1, body,
                             jnp.full(acc_ref.shape, neg, jnp.float32))
    acc_ref[...] = jnp.maximum(acc_ref[...], tile_acc)

    @pl.when(i == pl.num_programs(1) - 1)
    def _finalize():
        # single bulk, lane-dense store (F padded to a multiple of 128).
        o_ref[...] = acc_ref[...].astype(o_ref.dtype)


# ---------------------------------------------------------------------------
# wrapper
# ---------------------------------------------------------------------------
def graph_pooling(x, batch, num_graphs, pooling_type, *, tile_n=512, tile_f=512):
    """x: [N, F], batch: [N] int (sorted, values in [0, num_graphs)) -> [num_graphs, F]."""
    if pooling_type not in ("mean", "max"):
        raise ValueError("Invalid pooling type")

    n, f = x.shape

    # Lane/sublane friendly tiling: tiles are multiples of 128 and divide the
    # padded extents. Sized conservatively so double-buffered blocks fit the
    # 32 MiB scoped-VMEM default on all of v5e / v6e / v7x.
    tile_n = _round_up(min(tile_n, _round_up(n, 128)), 128)
    tile_f = _round_up(min(tile_f, _round_up(f, 128)), 128)
    n_pad = _round_up(n, tile_n)
    f_pad = _round_up(f, tile_f)
    n_tiles = n_pad // tile_n
    f_tiles = f_pad // tile_f

    x_p = jnp.zeros((n_pad, f_pad), x.dtype).at[:n, :f].set(x)
    batch_i32 = batch.astype(jnp.int32)
    # Sentinel graph id `num_graphs` for padded rows -> contributes to no graph.
    batch_p = jnp.full((n_pad,), num_graphs, dtype=jnp.int32).at[:n].set(batch_i32)

    out_shape = jax.ShapeDtypeStruct((num_graphs, f_pad), x.dtype)
    params = pltpu.CompilerParams(
        dimension_semantics=("parallel", "arbitrary"),   # F parallel (v7x 2 TCs), N reduces
        vmem_limit_bytes=32 * 1024 * 1024,
    )

    if pooling_type == "mean":
        kernel = functools.partial(_mean_kernel, num_graphs=num_graphs)
        out = pl.pallas_call(
            kernel,
            out_shape=out_shape,
            grid_spec=pltpu.PrefetchScalarGridSpec(
                num_scalar_prefetch=0,
                grid=(f_tiles, n_tiles),
                in_specs=[
                    pl.BlockSpec((1, tile_n), lambda j, i: (0, i)),        # batch (lane-dense)
                    pl.BlockSpec((tile_n, tile_f), lambda j, i: (i, j)),   # x
                ],
                out_specs=pl.BlockSpec((num_graphs, tile_f), lambda j, i: (0, j)),
                scratch_shapes=[
                    pltpu.VMEM((num_graphs, tile_f), jnp.float32),   # running sums
                    pltpu.VMEM((num_graphs, 1), jnp.float32),        # running counts
                ],
            ),
            compiler_params=params,
        )(batch_p.reshape(1, n_pad), x_p)
    else:  # max
        # Per-graph node ranges (torch_geometric guarantees `batch` is sorted).
        ptr = jnp.searchsorted(
            batch_i32, jnp.arange(num_graphs + 1, dtype=jnp.int32)).astype(jnp.int32)
        kernel = functools.partial(_max_kernel, num_graphs=num_graphs, tile_n=tile_n)
        out = pl.pallas_call(
            kernel,
            out_shape=out_shape,
            grid_spec=pltpu.PrefetchScalarGridSpec(
                num_scalar_prefetch=2,                       # batch, ptr -> SMEM
                grid=(f_tiles, n_tiles),
                in_specs=[
                    pl.BlockSpec((tile_n, tile_f), lambda j, i, b, p: (i, j)),  # x
                ],
                out_specs=pl.BlockSpec((num_graphs, tile_f),
                                       lambda j, i, b, p: (0, j)),
                scratch_shapes=[
                    pltpu.VMEM((num_graphs, tile_f), jnp.float32),   # running max
                ],
            ),
            compiler_params=params,
        )(batch_p, ptr, x_p)

    return out[:, :f]


# ---------------------------------------------------------------------------
# self-test
# ---------------------------------------------------------------------------
if __name__ == "__main__":
    key = jax.random.PRNGKey(0)

    # Small synthetic graph batch: N=200 nodes, F=200 features, B=3 graphs.
    # tile_n=tile_f=128 -> a (2, 2) grid, exercising both the N accumulator
    # sweep and the parallel F axis.
    N, F, B = 200, 200, 3
    x = jax.random.normal(key, (N, F), dtype=jnp.float32)
    sizes = (70, 60, 70)
    batch = jnp.concatenate(
        [jnp.full((s,), g, dtype=jnp.int32) for g, s in enumerate(sizes)]
    )

    out_mean = jax.block_until_ready(
        graph_pooling(x, batch, B, "mean", tile_n=128, tile_f=128))
    out_max = jax.block_until_ready(
        graph_pooling(x, batch, B, "max", tile_n=128, tile_f=128))

    # Reference (plain JAX segment reductions).
    ref_mean = jnp.stack([x[batch == g].mean(axis=0) for g in range(B)])
    ref_max = jnp.stack([x[batch == g].max(axis=0) for g in range(B)])

    assert out_mean.shape == (B, F) and out_max.shape == (B, F)
    # Tolerance allows for MXU f32 matmul precision on the summation path.
    assert jnp.allclose(out_mean, ref_mean, atol=5e-3, rtol=5e-3)
    assert jnp.allclose(out_max, ref_max, atol=1e-6, rtol=1e-6)

    print("KERNEL_OK")
</pallas_src>

<mosaic_0001>
module attributes {stable_mosaic.version = 11 : i64} {
  func.func @_mean_kernel(%arg0: i32, %arg1: i32, %arg2: memref<1x128xi32, #tpu.memory_space<vmem>>, %arg3: memref<128x128xf32, #tpu.memory_space<vmem>>, %arg4: memref<3x128xf32, #tpu.memory_space<vmem>>, %arg5: memref<3x128xf32, #tpu.memory_space<vmem>>, %arg6: memref<3x1xf32, #tpu.memory_space<vmem>>) attributes {dimension_semantics = [#tpu.dimension_semantics<parallel>, #tpu.dimension_semantics<arbitrary>], iteration_bounds = array<i64: 2, 2>, scalar_prefetch = 0 : i64, scratch_operands = 2 : i64, tpu.core_type = #tpu.core_type<tc>, window_params = [{transform_indices = @transform_0, window_bounds = array<i64: 1, 128>}, {transform_indices = @transform_1, window_bounds = array<i64: 128, 128>}, {transform_indices = @transform_2, window_bounds = array<i64: 3, 128>}]} {
    %c0_i32 = arith.constant 0 : i32
    %0 = arith.cmpi eq, %arg1, %c0_i32 : i32
    %1 = arith.extui %0 : i1 to i32
    %c0_i32_0 = arith.constant 0 : i32
    %2 = arith.cmpi ne, %1, %c0_i32_0 : i32
    scf.if %2 {
      %cst_14 = arith.constant 0.000000e+00 : f32
      %23 = vector.broadcast %cst_14 : f32 to vector<3x128xf32>
      %c0_15 = arith.constant 0 : index
      %c0_16 = arith.constant 0 : index
      %24 = vector.load %arg5[%c0_15, %c0_16] : memref<3x128xf32, #tpu.memory_space<vmem>>, vector<3x128xf32>
      tpu.vector_store %arg5[%c0_15, %c0_16], %23 {strides = array<i32>} : memref<3x128xf32, #tpu.memory_space<vmem>>, vector<3x128xf32>,
      %cst_17 = arith.constant 0.000000e+00 : f32
      %25 = vector.broadcast %cst_17 : f32 to vector<3x1xf32>
      %c0_18 = arith.constant 0 : index
      %c0_19 = arith.constant 0 : index
      %26 = vector.load %arg6[%c0_18, %c0_19] : memref<3x1xf32, #tpu.memory_space<vmem>>, vector<3x1xf32>
      tpu.vector_store %arg6[%c0_18, %c0_19], %25 {strides = array<i32>} : memref<3x1xf32, #tpu.memory_space<vmem>>, vector<3x1xf32>,
    } else {
    }
    %3 = tpu.iota {dimensions = array<i32: 0>} : vector<3x1xi32>
    %c0 = arith.constant 0 : index
    %c0_1 = arith.constant 0 : index
    %4 = vector.load %arg2[%c0, %c0_1] : memref<1x128xi32, #tpu.memory_space<vmem>>, vector<1x128xi32>
    %5 = vector.broadcast %3 : vector<3x1xi32> to vector<3x128xi32>
    %6 = vector.broadcast %4 : vector<1x128xi32> to vector<3x128xi32>
    %7 = arith.cmpi eq, %5, %6 : vector<3x128xi32>
    %8 = arith.extui %7 : vector<3x128xi1> to vector<3x128xi32>
    %9 = arith.sitofp %8 : vector<3x128xi32> to vector<3x128xf32>
    %c0_2 = arith.constant 0 : index
    %c0_3 = arith.constant 0 : index
    %10 = vector.load %arg5[%c0_2, %c0_3] : memref<3x128xf32, #tpu.memory_space<vmem>>, vector<3x128xf32>
    %c0_4 = arith.constant 0 : index
    %c0_5 = arith.constant 0 : index
    %11 = vector.load %arg3[%c0_4, %c0_5] : memref<128x128xf32, #tpu.memory_space<vmem>>, vector<128x128xf32>
    %cst = arith.constant dense<0.000000e+00> : vector<3x128xf32>
    %12 = tpu.matmul %9, %11, %cst {dimension_numbers = #tpu.dot_dimension_numbers<[1], [0], [0], [1], [0, 0, 1, 1], [], []>} : vector<3x128xf32>, vector<128x128xf32>, vector<3x128xf32> -> vector<3x128xf32>
    %13 = arith.addf %10, %12 : vector<3x128xf32>
    %c0_6 = arith.constant 0 : index
    %c0_7 = arith.constant 0 : index
    %14 = vector.load %arg5[%c0_6, %c0_7] : memref<3x128xf32, #tpu.memory_space<vmem>>, vector<3x128xf32>
    tpu.vector_store %arg5[%c0_6, %c0_7], %13 {strides = array<i32>} : memref<3x128xf32, #tpu.memory_space<vmem>>, vector<3x128xf32>,
    %c0_8 = arith.constant 0 : index
    %c0_9 = arith.constant 0 : index
    %15 = vector.load %arg6[%c0_8, %c0_9] : memref<3x1xf32, #tpu.memory_space<vmem>>, vector<3x1xf32>
    %cst_10 = arith.constant dense<0.000000e+00> : vector<3xf32>
    %16 = vector.multi_reduction <add>, %9, %cst_10 [1] : vector<3x128xf32> to vector<3xf32>
    %17 = vector.shape_cast %16 : vector<3xf32> to vector<3x1xf32>
    %18 = arith.addf %15, %17 : vector<3x1xf32>
    %c0_11 = arith.constant 0 : index
    %c0_12 = arith.constant 0 : index
    %19 = vector.load %arg6[%c0_11, %c0_12] : memref<3x1xf32, #tpu.memory_space<vmem>>, vector<3x1xf32>
    tpu.vector_store %arg6[%c0_11, %c0_12], %18 {strides = array<i32>} : memref<3x1xf32, #tpu.memory_space<vmem>>, vector<3x1xf32>,
    %c1_i32 = arith.constant 1 : i32
    %20 = arith.cmpi eq, %arg1, %c1_i32 : i32
    %21 = arith.extui %20 : i1 to i32
    %c0_i32_13 = arith.constant 0 : i32
    %22 = arith.cmpi ne, %21, %c0_i32_13 : i32
    scf.if %22 {
      %c0_14 = arith.constant 0 : index
      %c0_15 = arith.constant 0 : index
      %23 = vector.load %arg6[%c0_14, %c0_15] : memref<3x1xf32, #tpu.memory_space<vmem>>, vector<3x1xf32>
      %cst_16 = arith.constant 1.000000e+00 : f32
      %24 = vector.broadcast %cst_16 : f32 to vector<3x1xf32>
      %25 = arith.maximumf %23, %24 : vector<3x1xf32>
      %26 = tpu.reciprocal %25 : vector<3x1xf32> -> vector<3x1xf32>
      %c0_17 = arith.constant 0 : index
      %c0_18 = arith.constant 0 : index
      %27 = vector.load %arg5[%c0_17, %c0_18] : memref<3x128xf32, #tpu.memory_space<vmem>>, vector<3x128xf32>
      %28 = vector.broadcast %26 : vector<3x1xf32> to vector<3x128xf32>
      %29 = arith.mulf %27, %28 : vector<3x128xf32>
      %c0_19 = arith.constant 0 : index
      %c0_20 = arith.constant 0 : index
      %30 = vector.load %arg4[%c0_19, %c0_20] : memref<3x128xf32, #tpu.memory_space<vmem>>, vector<3x128xf32>
      tpu.vector_store %arg4[%c0_19, %c0_20], %29 {strides = array<i32>} : memref<3x128xf32, #tpu.memory_space<vmem>>, vector<3x128xf32>,
    } else {
    }
    return
  }
  func.func @transform_0(%arg0: i32, %arg1: i32) -> (i32, i32) {
    %c0_i32 = arith.constant 0 : i32
    %c0_i32_0 = arith.constant 0 : i32
    return %c0_i32, %arg1 : i32, i32
  }
  func.func @transform_1(%arg0: i32, %arg1: i32) -> (i32, i32) {
    %c0_i32 = arith.constant 0 : i32
    return %arg1, %arg0 : i32, i32
  }
  func.func @transform_2(%arg0: i32, %arg1: i32) -> (i32, i32) {
    %c0_i32 = arith.constant 0 : i32
    %c0_i32_0 = arith.constant 0 : i32
    return %c0_i32, %arg0 : i32, i32
  }
}

</mosaic_0001>

<bundles_post_ra>
// kernel: tpu_custom_call.1
= control target key start
LH: loop header
LB: loop body
LE: loop exit
PB: predicated region body
PF: predicated region fallthrough
CT: control target
= control target key end

     0   :  { %s1213_s0 = inlined_call_operand.hbm [shape: s32[1,256], index: 0, kind: input, shape index: {}]   ;;  %s1214_s1 = inlined_call_operand.hbm [shape: f32[256,256], index: 1, kind: input, shape index: {}]   ;;  %s1215_s2 = inlined_call_operand.hbm [shape: f32[3,256], index: 2, kind: output, shape index: {}]  }
   0x1   :  { %1223 = sst [smem:[#allocation21_spill]] %s1213_s0 }
   0x2   :  { %7 = vsyncpa [#allocation5], 0 }
   0x3   :  { %9 = vsyncpa [#allocation5 + $0x1], 0 }
   0x4   :  { %10 = vsyncpa [#allocation8], 0 }
   0x5   :  { %12 = vsyncpa [#allocation8 + $0x1], 0 }
   0x6   :  { %13 = vsyncpa [#allocation6], 0 }
   0x7   :  { %15 = vsyncpa [#allocation6 + $0x1], 0  ;;  %s907_s9 = smov 0   ;;  %s909_s10 = smov 0  }
   0x8   :  { %s911_s11 = smov 0   ;;  %s913_s12 = smov 0  }
   0x9   :  { %s915_s13 = smov 0   ;;  %s917_s14 = smov 0  }
   0xa   :  { %s919_s15 = smov 0   ;;  %s921_s16 = smov 0  }
   0xb   :  { %s923_s17 = smov 0   ;;  %s925_s18 = smov 0  }
   0xc   :  { %s927_s19 = smov 0   ;;  %s929_s20 = smov 0  }
   0xd   :  { %s931_s21 = smov 0   ;;  %s933_s22 = smov 0  }
   0xe LB: > { %1224 = sst [smem:[#allocation13_spill]] %s835_s11  ;;  %s459_s23 = sadd.s32 4294967295, %s879_s22   ;;  %s879_s22 = sphi %s933_s22, %s21_s22   ;;  %s875_s21 = sphi %s931_s21, %s1265_s21   ;;  %s871_s20 = sphi %s929_s20, %s1253_s20   ;;  %s867_s19 = sphi %s927_s19, %s1264_s19   ;;  %s863_s18 = sphi %s925_s18, %s1263_s18   ;;  %s859_s17 = sphi %s923_s17, %s1251_s17   ;;  %s855_s16 = sphi %s921_s16, %s1262_s16   ;;  %s851_s15 = sphi %s919_s15, %s1261_s15   ;;  %s847_s14 = sphi %s917_s14, %s1260_s14   ;;  %s843_s13 = sphi %s915_s13, %s1259_s13   ;;  %s839_s12 = sphi %s913_s12, %s1258_s12   ;;  %s835_s11 = sphi %s911_s11, %s1248_s11   ;;  %s831_s10 = sphi %s909_s10, %s1257_s10   ;;  %s827_s9 = sphi %s907_s9, %s1256_s9  }
   0xf   : > { %1225 = sst [smem:[#allocation14_spill]] %s859_s17  ;;  %s460_s24 = sadd.s32 4294967294, %s879_s22  }
  0x10   : > { %1226 = sst [smem:[#allocation15_spill]] %s871_s20  ;;  %s30_s25 = sadd.s32 1, %s871_s20 }
  0x11   : > { %s33_s26 = sadd.s32 1, %s875_s21  ;;  %p31_p0 = scmp.ge.s32.totalorder %s30_s25, 2 }
  0x12   : > { %s40_s27 = sadd.s32 1, %s859_s17  ;;  %p47_p1 = scmp.ne.s32.totalorder %s859_s17, %s855_s16 }
  0x13   : > { %p48_p2 = scmp.eq.s32.totalorder %s879_s22, 0  ;;  %s1267_s25 = smov (%p31_p0, %s30_s25), 0 }
  0x14   : > { %1227 = sst [smem:[#allocation16_spill]] %s1267_s25  ;;  %s1269_s26 = smov (!%p31_p0, %s33_s26), %s875_s21 }
  0x15   : > { %s37_s28 = ssub.s32 %s871_s20, %s1267_s25  ;;  %p990_p3 = por %p48_p2, %p47_p1 }
  0x16   : > { %p35_p4 = scmp.ge.s32.totalorder %s1269_s26, 2  ;;  %p38_p5 = scmp.eq.s32.totalorder %s37_s28, 0 }
  0x17   : > { %p53_p6 = scmp.ne.s32.totalorder %s855_s16, %s851_s15  ;;  %p997_p7 = scmp.eq.s32.totalorder %s459_s23, 0 }
  0x18   : > { %s1271_s26 = smov (%p35_p4, %s1269_s26), 0  ;;  %s68_s7 = sadd.s32 1, %s847_s14 }
  0x19   : > { %1230 = sst [smem:[#allocation17_spill]] %s1271_s26  ;;  %p1008_p8 = por %p997_p7, %p53_p6 }
  0x1a   : > { %s1004_s3 = scalar_select %p38_p5, %s859_s17, %s40_s27  }
  0x1b   : > { %s64_s5 = ssub.s32 %s875_s21, %s1271_s26  ;;  %p75_p10 = scmp.ne.s32.totalorder %s847_s14, %s843_s13 }
  0x1c   : > { %1231 = sst [smem:[#allocation18_spill]] %s1004_s3  ;;  %s65_s6 = sor.u32 %s64_s5, %s37_s28 }
  0x1d   : > { %p66_p9 = scmp.eq.s32.totalorder %s65_s6, 0  ;;  %p81_p11 = scmp.ne.s32.totalorder %s843_s13, %s839_s12 }
  0x1e   : > { %p92_p12 = scmp.eq.s32.totalorder %s64_s5, 0  ;;  %p1024_p13 = por %p75_p10, %p48_p2 }
  0x1f   : > { %s1020_s8 = scalar_select %p66_p9, %s847_s14, %s68_s7  }
  0x20   : > { %p1030_p0 = por %p81_p11, %p997_p7  ;;  %s94_s28 = sadd.s32 1, %s835_s11 }
  0x21   : > { %1233 = sst [smem:[#allocation19_spill]] %s1020_s8  ;;  %p104_p1 = scmp.ne.s32.totalorder %s835_s11, %s831_s10 }
  0x22   : > { %s1235_s27 = scalar_select %p1030_p0, 1, 0 }
  0x23   : > { %s1038_s6 = scalar_select %p92_p12, %s835_s11, %s94_s28  }
  0x24   : > { %p105_p4 = scmp.eq.s32.totalorder %s459_s23, 3  ;;  %p110_p2 = scmp.ne.s32.totalorder %s831_s10, %s827_s9 }
  0x25   : > { %1236 = sst [smem:[#allocation20_spill]] %s1038_s6  ;;  %p111_p5 = scmp.eq.s32.totalorder %s460_s24, 3 }
  0x26   : > { %p1046_p6 = por %p105_p4, %p104_p1  ;;  %p550_p7 = scmp.lt.s32.totalorder %s879_s22, 4 }
  0x27   : > { %p1051_p9 = por %p111_p5, %p110_p2  ;;  %s131_s5 = sand.u32 1, %s859_s17  }
  0x28   : > { %s1237_s12 = scalar_select %p1046_p6, 1, 0 }
  0x29   : > { %s1238_s30 = scalar_select %p1051_p9, 1, 0 }
  0x2a   : > { %s463_s7 = sshll.u32 %s871_s20, 4  ;;  %s134_s28 = scalar_lea.vmem [#allocation4], %s131_s5 }
  0x2b   : > { %s141_s26 = sshll.u32 %s134_s28, 4  ;;  %s1239_s0 = sld [smem:[#allocation21_spill]]  ;;  %s142_s26 = int_to_ptr.vmem [resolvable:$true] %s141_s26 }
  0x2c   : > { %p1062_p10 = pnand %p550_p7, %p990_p3  ;;  %s480_s8 = sshll.u32 %s871_s20, 5 }
  0x2d   : > { %p1069_p11 = pnand %p550_p7, %p1024_p13  ;;  %p468_p12 = scmp.ge.s32.totalorder %s879_s22, 1 }
  0x2e   : > { %p169_p1 = scmp.lt.s32.totalorder %s879_s22, 5  ;;  %s132_s28 = scalar_lea.sflag [#allocation5], %s131_s5 }
  0x2f   : > { %p677_p4 = pneg %p1062_p10  ;;  %s688_s25 = scalar_lea.vmem %s142_s26, 16 }
  0x30   : > { %p689_p2 = scmp.ne.s32.totalorder %s142_s26, %s688_s25  ;;  %s881_s29 = smov [#allocation4]  }
  0x31   : > { %s139_s23 = scalar_lea.hbm %s1239_s0, %s463_s7  ;;  %s693_s3 = sshll.u32 %s881_s29, 4  ;;  %s694_s3 = int_to_ptr.vmem [resolvable:$false] %s693_s3 }
  0x32   : > { %p691_p5 = pnand %p689_p2, %p677_p4  ;;  %s695_s7 = scalar_lea.vmem %s694_s3, 32 }
  0x33   : > { %p696_p3 = scmp.lt.s32.totalorder %s142_s26, %s694_s3  ;;  %p697_p6 = scmp.lt.s32.totalorder %s695_s7, %s688_s25 }
  0x34   : > { %p692_p9 = pneg %p691_p5 }
  0x35   : > { %p698_p0 = por %p697_p6, %p696_p3 }
  0x37   : > { %p699_p13 = pnand %p698_p0, %p692_p9 }
  0x39   : > { %702 = shalt.err (!%p699_p13)
}
  0x3a   : > { %542 = dma.hbm_to_vmem [thread:$0]  (!%p1062_p10), %s139_s23, 16, %s142_s26, %s132_s28  }
  0x3b   : > { %p1083_p7 = pnand %p468_p12, %p169_p1  ;;  %s148_s5 = sand.u32 1, %s847_s14  }
  0x3c   : > { %s158_s29 = sadd.s32 %s875_s21, %s480_s8  ;;  %s464_s25 = sshll.u32 %s148_s5, 7 }
  0x3d   : > { %s467_s3 = sshll.u32 %s158_s29, 7  ;;  %s152_s20 = scalar_lea.vmem [#allocation7], %s464_s25 }
  0x3e   : > { %s160_s24 = scalar_lea.hbm %s1214_s1, %s467_s3  ;;  %s161_s17 = sshll.u32 %s152_s20, 4  ;;  %s162_s17 = int_to_ptr.vmem [resolvable:$true] %s161_s17 }
  0x3f   : > { %s149_s11 = scalar_lea.sflag [#allocation8], %s148_s5  ;;  %p705_p0 = pneg %p1069_p11 }
  0x40   : > { %s716_s26 = scalar_lea.vmem %s162_s17, 2048  ;;  %s882_s23 = smov [#allocation7]  }
  0x41   : > { %p717_p6 = scmp.ne.s32.totalorder %s162_s17, %s716_s26  ;;  %s721_s28 = sshll.u32 %s882_s23, 4  ;;  %s722_s28 = int_to_ptr.vmem [resolvable:$false] %s721_s28 }
  0x42   : > { %s723_s8 = scalar_lea.vmem %s722_s28, 4096  ;;  %p724_p12 = scmp.lt.s32.totalorder %s162_s17, %s722_s28 }
  0x43   : > { %p719_p9 = pnand %p717_p6, %p705_p0  ;;  %p725_p1 = scmp.lt.s32.totalorder %s723_s8, %s716_s26 }
  0x45   : > { %p720_p10 = pneg %p719_p9  ;;  %p726_p4 = por %p725_p1, %p724_p12 }
  0x47   : > { %p727_p2 = pnand %p726_p4, %p720_p10 }
  0x49   : > { %730 = shalt.err (!%p727_p2)
}
  0x4a   : > { %s883_s0 = smov 256   ;;  %s884_s20 = smov 128  }
  0x4b   : > { %s885_s29 = smov 8   ;;  %173 = sbr.rel (%p1083_p7) target bundleno = 491 (0x1eb), region = 28 }
  0x4c   : > { %545 = dma.hbm_to_vmem [thread:$0]  (!%p1069_p11), %s160_s24, 2048, %s162_s17, %s149_s11, %s883_s0, %s884_s20, %s885_s29  }
  0x4d   : > { %s175_s5 = sand.u32 (!%p1083_p7), 1, %s855_s16  }
  0x4e   : > { %s176_s25 = scalar_lea.sflag (!%p1083_p7), [#allocation5], %s175_s5  ;;  %s1099_s3 = scalar_lea.vmem (!%p1083_p7), [#allocation4], %s175_s5 }
  0x50   : > { %814 = dma.done.wait (%p1008_p8), %s176_s25, 16  }
  0x51   : > { %816 = vsyncadd (%p1008_p8), %s176_s25, 4294967280  ;;  %s183_s7 = sand.u32 1, %s843_s13   ;;  %p1243_p11 = scmp.ne.s32.totalorder %s1235_s27, 0 }
  0x52   : > { %s469_s26 = sshll.u32 %s183_s7, 7  ;;  %s184_s6 = scalar_lea.sflag [#allocation8], %s183_s7 }
  0x53   : > { %s1106_s11 = scalar_lea.vmem [#allocation7], %s469_s26 }
  0x54   : > { %818 = dma.done.wait (%p1243_p11), %s184_s6, 2048  }
  0x55   : > { %820 = vsyncadd (%p1243_p11), %s184_s6, 4294965248  ;;  %s209_s17 = sand.u32 1, %s831_s10   ;;  %p471_p8 = scmp.ne.s32.totalorder %s863_s18, 0 }
  0x56   : > { %s1115_s15 = sshll.u32 %s209_s17, 2 }
  0x57   : > { %s211_s4 = scalar_lea.vmem [#allocation9], %s1115_s15  ;;  %216 = sbr.rel (%p471_p8) target bundleno = 94 (0x5e), region = 40 }
  0x5c   : > { %vm218_vm0 = vcmask 2048   ;;  %v886_v0 = vmov 0.0  }
  0x5d   : > { %217 = vst [vmem:[#allocation2] sm:$0x7] %v886_v0  ;;  %219 = vst.msk [vmem:[#allocation3] sm:$0x7] %vm218_vm0, %v886_v0 }
  0x5e PF: > { %v246_v1 = vld [vmem:[%s1106_s11 + $0x78] sm:$0xff]  ;;  %v220_v2 = vlaneseq  ;;  %v887_v3 = vmov 0.0   ;;  %v245_v4 = vld [vmem:[%s1106_s11 + $0x70] sm:$0xff]  ;;  %vm888_vm1 = vmmov 0   ;;  %v244_v6 = vld [vmem:[%s1106_s11 + $0x68] sm:$0xff]  ;;  %vm320_vm2 = vcmask 1042432  }
  0x5f   : > { %498 = vmatprep.subr.mxu0 %v887_v3  ;;  %530 = vmatprep.mubr.msk.f32.mxu0 %vm888_vm1, %v887_v3  ;;  %v243_v7 = vld [vmem:[%s1106_s11 + $0x60] sm:$0xff]  ;;  %v472_v8 = vld [vmem:[%s1099_s3] ss:$0 sm:$0xff]  ;;  %v242_v9 = vld [vmem:[%s1106_s11 + $0x58] sm:$0xff]  ;;  %v889_v23 = vmov 1.0   ;;  %vm325_vm4 = vcmask 2048  }
  0x60   : > { %499 = vmatpush3.msra.mxu0 %v246_v1  ;;  %v221_v5 = vshrl.u32 %v220_v2, 7  ;;  %v241_v12 = vld [vmem:[%s1106_s11 + $0x50] sm:$0xff]  ;;  %v240_v13 = vld [vmem:[%s1106_s11 + $0x48] sm:$0xff]  ;;  %v239_v14 = vld [vmem:[%s1106_s11 + $0x40] sm:$0xff]  ;;  %p475_p5 = scmp.ne.s32.totalorder %s863_s18, 1 }
  0x61   : > { %500 = vmatprep.subr.mxu0 %v887_v3  ;;  %v238_v15 = vld [vmem:[%s1106_s11 + $0x38] sm:$0xff]  ;;  %v237_v16 = vld [vmem:[%s1106_s11 + $0x30] sm:$0xff]  ;;  %v236_v17 = vld [vmem:[%s1106_s11 + $0x28] sm:$0xff] }
  0x62   : > { %501 = vmatpush3.msra.mxu0 %v245_v4  ;;  %vm227_vm3 = vcmp.eq.s32.totalorder %v221_v5, %v472_v8  ;;  %v235_v18 = vld [vmem:[%s1106_s11 + $0x20] sm:$0xff]  ;;  %v234_v19 = vld [vmem:[%s1106_s11 + $0x18] sm:$0xff]  ;;  %v233_v20 = vld [vmem:[%s1106_s11 + $0x10] sm:$0xff] }
  0x63   : > { %502 = vmatprep.subr.mxu0 %v887_v3  ;;  %v473_v10 = vsel %vm227_vm3, 1.0, %v887_v3  ;;  %v232_v21 = vld [vmem:[%s1106_s11 + $0x8] sm:$0xff]  ;;  %v231_v22 = vld [vmem:[%s1106_s11] sm:$0xff] }
  0x64   : > { %503 = vmatpush3.msra.mxu0 %v244_v6  ;;  %v321_v11 = vsel %vm320_vm2, %v473_v10, 0.0  ;;  %v319_v24 = vld [vmem:[#allocation3] sm:$0x7]  ;;  %v230_v27 = vld [vmem:[#allocation2] sm:$0x7] }
  0x65   : > { %504 = vmatprep.subr.mxu0 %v887_v3  ;;  %322 = vadd.xlane.f32.xlu0 %v321_v11 }
  0x66   : > { %505 = vmatpush3.msra.mxu0 %v243_v7 }
  0x67   : > { %506 = vmatprep.subr.mxu0 %v887_v3 }
  0x68   : > { %507 = vmatpush3.msra.mxu0 %v242_v9 }
  0x69   : > { %508 = vmatprep.subr.mxu0 %v887_v3 }
  0x6a   : > { %509 = vmatpush3.msra.mxu0 %v241_v12 }
  0x6b   : > { %510 = vmatprep.subr.mxu0 %v887_v3 }
  0x6c   : > { %511 = vmatpush3.msra.mxu0 %v240_v13 }
  0x6d   : > { %512 = vmatprep.subr.mxu0 %v887_v3 }
  0x6e   : > { %513 = vmatpush3.msra.mxu0 %v239_v14 }
  0x6f   : > { %514 = vmatprep.subr.mxu0 %v887_v3 }
  0x70   : > { %515 = vmatpush3.msra.mxu0 %v238_v15 }
  0x71   : > { %516 = vmatprep.subr.mxu0 %v887_v3 }
  0x72   : > { %517 = vmatpush3.msra.mxu0 %v237_v16 }
  0x73   : > { %518 = vmatprep.subr.mxu0 %v887_v3 }
  0x74   : > { %519 = vmatpush3.msra.mxu0 %v236_v17 }
  0x75   : > { %520 = vmatprep.subr.mxu0 %v887_v3 }
  0x76   : > { %521 = vmatpush3.msra.mxu0 %v235_v18 }
  0x77   : > { %522 = vmatprep.subr.mxu0 %v887_v3 }
  0x78   : > { %523 = vmatpush3.msra.mxu0 %v234_v19 }
  0x79   : > { %524 = vmatprep.subr.mxu0 %v887_v3 }
  0x7a   : > { %525 = vmatpush3.msra.mxu0 %v233_v20 }
  0x7b   : > { %526 = vmatprep.subr.mxu0 %v887_v3 }
  0x7c   : > { %527 = vmatpush3.msra.mxu0 %v232_v21 }
  0x7d   : > { %528 = vmatprep.subr.mxu0 %v887_v3 }
  0x7e   : > { %529 = vmatpush3.msra.mxu0 %v231_v22 }
  0x7f   : > { %531 = vmatmul.mubr.msk.f32.vlgmr.msra.gmra.mxu0 %vm227_vm3, %v889_v23 }
  0xee   : > { %v323_v25 = vpop.xlane.xlu0 %322 }
  0xef   : > { %v324_v26 = vadd.f32 %v323_v25, %v319_v24 }
  0xf1   : > { %326 = vst.msk [vmem:[#allocation3] sm:$0x7] %vm325_vm4, %v324_v26 }
 0x13e   : > { %330 = sbr.rel (%p475_p5) target bundleno = 467 (0x1d3), region = 44 }
 0x13f   : > { %v313_v28 = vpop.f32.mrf.mxu0 }
 0x140   : > { %v317_v29 = vadd.f32 %v313_v28, %v230_v27 }
 0x141   : > { %v532_v30 = vpop.f32.mrf.mxu0 }
 0x142   : > { %318 = vst [vmem:[#allocation2] sm:$0x7] %v317_v29 }
 0x143   : > { %v331_v31 = vld [vmem:[#allocation3] sm:$0x7]  ;;  %v890_v32 = vmov 0  }
 0x144   : > { %672 = vset.pattern.permute.xlu0 %v890_v32  ;;  %v332_v33 = vmax.f32 %v331_v31, 1.0 }
 0x146   : > { %673 = vrcp.f32 %v332_v33 }
 0x149   : > { %v334_v35 = vld [vmem:[#allocation2] sm:$0x7] }
 0x153   : > { %v674_v34 = vpop.eup %673 }
 0x154   : > { %337 = vperm.xlu0 %672, %v674_v34  }
 0x1cf   : > { %v338_v36 = vpop.permute.xlu0 %337 }
 0x1d0   : > { %v340_v37 = vmul.f32 %v338_v36, %v334_v35 }
 0x1d2   : > { %341 = vst [vmem:[%s211_s4] sm:$0x7] %v340_v37 }
 0x1d3 PF: > { %s477_s18 = sshll.u32 %s867_s19, 6  ;;  %s356_s28 = sshll.u32 %s211_s4, 4  ;;  %s357_s28 = int_to_ptr.vmem [resolvable:$true] %s356_s28 }
 0x1d4   : > { %s354_s23 = scalar_lea.hbm %s1215_s2, %s477_s18  ;;  %s343_s8 = scalar_lea.sflag [#allocation6], %s209_s17 }
 0x1d5   : > { %s731_s0 = scalar_lea.vmem %s357_s28, 64  ;;  %p1244_p13 = scmp.ne.s32.totalorder %s1237_s12, 0 }
 0x1d6   : > { %p732_p3 = scmp.ne.s32.totalorder %s357_s28, %s731_s0  ;;  %s891_s20 = smov [#allocation9]  }
 0x1d7   : > { %s735_s29 = sshll.u32 %s891_s20, 4  ;;  %s736_s29 = int_to_ptr.vmem [resolvable:$false] %s735_s29 }
 0x1d8   : > { %p733_p7 = pnand %p732_p3, %p1244_p13  ;;  %s737_s5 = scalar_lea.vmem %s736_s29, 128 }
 0x1d9   : > { %p738_p6 = scmp.lt.s32.totalorder %s357_s28, %s736_s29  ;;  %p739_p9 = scmp.lt.s32.totalorder %s737_s5, %s731_s0 }
 0x1da   : > { %p734_p0 = pneg %p733_p7 }
 0x1db   : > { %p740_p10 = por %p739_p9, %p738_p6 }
 0x1dd   : > { %p741_p12 = pnand %p740_p10, %p734_p0 }
 0x1df   : > { %744 = shalt.err (!%p741_p12)
}
 0x1e0   : > { %s745_s19 = scalar_lea.hbm %s354_s23, 64  ;;  %s749_s7 = scalar_lea.hbm %s1215_s2, 128 }
 0x1e1   : > { %p746_p1 = scmp.ne.s32.totalorder %s354_s23, %s745_s19  ;;  %p750_p11 = scmp.lt.s32.totalorder %s354_s23, %s1215_s2 }
 0x1e2   : > { %p751_p8 = scmp.lt.s32.totalorder %s749_s7, %s745_s19 }
 0x1e3   : > { %p747_p4 = pnand %p746_p1, %p1244_p13 }
 0x1e4   : > { %p752_p5 = por %p751_p8, %p750_p11 }
 0x1e5   : > { %p748_p2 = pneg %p747_p4 }
 0x1e7   : > { %p753_p3 = pnand %p752_p5, %p748_p2 }
 0x1e9   : > { %756 = shalt.err (!%p753_p3)
}
 0x1ea   : > { %537 = dma.vmem_to_hbm [thread:$0]  (%p1244_p13), %s357_s28, 64, %s354_s23, %s343_s8  }
 0x1eb PF: > { %p551_p7 = scmp.ge.s32.totalorder %s879_s22, 2  ;;  %s368_s11 = sand.u32 1, %s827_s9  }
 0x1ec   : > { %p1245_p0 = scmp.ne.s32.totalorder %s1238_s30, 0  ;;  %s369_s17 = scalar_lea.sflag [#allocation6], %s368_s11 }
 0x1ee   : > { %p547_p6 = pnand %p551_p7, %p1245_p0 }
 0x1f0   : > { %p548_p9 = pneg %p547_p6 }
 0x1f2   : > { %822 = dma.done.wait (%p548_p9), %s369_s17, 64  }
 0x1f3   : > { %824 = vsyncadd (%p548_p9), %s369_s17, 4294967232  ;;  %s21_s22 = sadd.s32 1, %s879_s22   ;;  %s1247_s12 = sld [smem:[#allocation13_spill]] }
 0x1f4   : > { %p1166_p10 = scmp.ge.s32.totalorder %s21_s22, 6   ;;  %s1248_s11 = sld [smem:[#allocation20_spill]] }
 0x1f5   : > { %s1249_s4 = sld [smem:[#allocation19_spill]]  ;;  %s1256_s9 = smov %s831_s10 }
 0x1f6   : > { %s1250_s18 = sld [smem:[#allocation14_spill]]  ;;  %s1261_s15 = smov %s855_s16 }
 0x1f7   : > { %s1251_s17 = sld [smem:[#allocation18_spill]]  ;;  %s1264_s19 = smov %s875_s21 }
 0x1f8   : > { %s1252_s30 = sld [smem:[#allocation15_spill]] }
 0x1f9   : > { %s1253_s20 = sld [smem:[#allocation16_spill]]  ;;  %s1257_s10 = smov %s1247_s12 }
 0x1fa   : > { %s1254_s27 = sld [smem:[#allocation17_spill]]  ;;  %s1258_s12 = smov %s843_s13 }
 0x1fb   : > { %s1259_s13 = smov %s847_s14  ;;  %s1260_s14 = smov %s1249_s4 }
 0x1fc   : > { %s1262_s16 = smov %s1250_s18  ;;  %20 = sbr.rel (!%p1166_p10) target bundleno = 14 (0xe), region = 94 }
 0x1fe   : > { %s1263_s18 = smov %s1252_s30 }
 0x200   : > { %s1265_s21 = smov %s1254_s27 }
 0x201   :  { %374 = vsyncpa [#allocation5], 1 }
 0x202   :  { %376 = vsyncpa [#allocation5 + $0x1], 1 }
 0x203   :  { %377 = vsyncpa [#allocation8], 1 }
 0x204   :  { %379 = vsyncpa [#allocation8 + $0x1], 1 }
 0x205   :  { %380 = vsyncpa [#allocation6], 1 }
 0x206   :  { %382 = vsyncpa [#allocation6 + $0x1], 1 }

</bundles_post_ra>
